<compile_context>
chip_gen: v6e
topology: v6e:2x2x1
jax: 0.10.0
libtpu: 0.0.40
codegen_flags: <defaults>
</compile_context>

<pallas_src>
import functools

import numpy as np
import jax
import jax.numpy as jnp
from jax import lax
from jax.experimental import pallas as pl
from jax.experimental.pallas import tpu as pltpu

LRELU_SLOPE = 0.1


def get_padding(kernel_size, dilation=1):
    return int((kernel_size * dilation - dilation) / 2)


def _lrelu(v):
    return jnp.where(v >= 0, v, LRELU_SLOPE * v)


def _fused_resblock2_kernel(xc_ref, xh_ref,
                            w1_ref, p1_ref, b1_ref,
                            w2_ref, p2_ref, b2_ref,
                            o_ref,
                            *, kernel_size, dilations, seq_len, t_tile):
    K = kernel_size
    d1, d2 = dilations
    pad1 = get_padding(K, d1)
    pad2 = get_padding(K, d2)
    H = pad1 + pad2                 # halo columns per side
    TT = t_tile
    W2 = TT + 2 * pad2              # width on which stage-1 output is needed

    xc = xc_ref[0]                  # (C, TT)   current time tile
    xh = xh_ref[0, 0]               # (C, 2H)   [left halo | right halo]
    C = xc.shape[0]

    # Halo-extended window covering global columns [s-H, s+TT+H).
    xe = jnp.concatenate([xh[:, :H], xc, xh[:, H:]], axis=1)      # (C, TT+2H)

    # ---- stage 1: lrelu -> depthwise conv (d1) -> 1x1 conv -> residual ----
    a1 = _lrelu(xe)                                               # lrelu(0)=0, so
    w1 = w1_ref[...]                                              # zero halos give
    z1 = w1[:, 0:1] * a1[:, 0:W2]                                 # exact zero-padding
    for k in range(1, K):                                         # static unroll
        z1 = z1 + w1[:, k:k + 1] * a1[:, k * d1:k * d1 + W2]
    y1 = jnp.dot(p1_ref[...], z1, preferred_element_type=jnp.float32)
    y1 = y1 + b1_ref[...]                                         # folded bias
    x1 = y1 + xe[:, pad1:pad1 + W2]                               # residual, (C, W2)

    # ---- stage-2 activation; enforce zero padding outside the sequence ----
    a2 = _lrelu(x1)
    s = pl.program_id(1) * TT                                     # tile start (global)
    col = lax.broadcasted_iota(jnp.int32, (C, W2), 1) + (s - pad2)
    a2 = jnp.where((col >= 0) & (col < seq_len), a2, 0.0)

    # ---- stage 2: depthwise conv (d2) -> 1x1 conv -> residual ----
    w2 = w2_ref[...]
    z2 = w2[:, 0:1] * a2[:, 0:TT]
    for k in range(1, K):
        z2 = z2 + w2[:, k:k + 1] * a2[:, k * d2:k * d2 + TT]
    y2 = jnp.dot(p2_ref[...], z2, preferred_element_type=jnp.float32)
    y2 = y2 + b2_ref[...]
    out = y2 + x1[:, pad2:pad2 + TT]

    o_ref[0] = out.astype(o_ref.dtype)


def _pick_t_tile(T):
    # Prefer lane-dense tiles that are multiples of 128 and divide T.
    for tt in (512, 384, 256, 128):
        if T % tt == 0:
            return tt
    return T   # fall back to a single full-length tile (full-dim block is legal)


def resblock2_forward(x, params, *, kernel_size=3, dilations=(1, 3), t_tile=None):
    """x: (N, C, T) float32.  params: two per-stage dicts with effective weights
    w_dw (C, K), b_dw (C, 1), w_pw (C, C), b_pw (C, 1)."""
    assert kernel_size % 2 == 1, "ResBlock2 'same' padding assumes odd kernel_size"
    assert len(dilations) == 2 and len(params) == 2
    N, C, T = x.shape
    K = kernel_size
    d1, d2 = dilations
    pad1 = get_padding(K, d1)
    pad2 = get_padding(K, d2)
    H = pad1 + pad2

    TT = _pick_t_tile(T) if t_tile is None else t_tile
    assert T % TT == 0 and (TT % 128 == 0 or TT == T)
    num_t = T // TT

    # Tiny per-tile halo blocks (H columns on each side, zeros outside [0, T)).
    xp = jnp.pad(x, ((0, 0), (0, 0), (H, H)))                      # (N, C, T+2H)
    tile_start = jnp.arange(num_t)[:, None] * TT
    left_cols = tile_start + jnp.arange(H)[None, :]                # global [s-H, s)
    right_cols = tile_start + TT + H + jnp.arange(H)[None, :]      # global [s+TT, s+TT+H)
    cols = jnp.concatenate([left_cols, right_cols], axis=1)        # (num_t, 2H)
    halos = jnp.transpose(xp[:, :, cols], (0, 2, 1, 3))            # (N, num_t, C, 2H)

    # Fold biases: W_pw @ (z + b_dw) + b_pw == W_pw @ z + (W_pw @ b_dw + b_pw).
    p1, p2 = params
    b1_tot = p1["w_pw"] @ p1["b_dw"] + p1["b_pw"]
    b2_tot = p2["w_pw"] @ p2["b_dw"] + p2["b_pw"]

    kernel = functools.partial(_fused_resblock2_kernel,
                               kernel_size=K, dilations=(d1, d2),
                               seq_len=T, t_tile=TT)
    const = lambda n, t: (0, 0)
    return pl.pallas_call(
        kernel,
        out_shape=jax.ShapeDtypeStruct((N, C, T), x.dtype),
        grid=(N, num_t),
        in_specs=[
            pl.BlockSpec((1, C, TT), lambda n, t: (n, 0, t)),        # x time tile
            pl.BlockSpec((1, 1, C, 2 * H), lambda n, t: (n, t, 0, 0)),  # halo edges
            pl.BlockSpec((C, K), const),                              # stage-1 dw weight
            pl.BlockSpec((C, C), const),                              # stage-1 pw weight
            pl.BlockSpec((C, 1), const),                              # stage-1 folded bias
            pl.BlockSpec((C, K), const),                              # stage-2 dw weight
            pl.BlockSpec((C, C), const),                              # stage-2 pw weight
            pl.BlockSpec((C, 1), const),                              # stage-2 folded bias
        ],
        out_specs=pl.BlockSpec((1, C, TT), lambda n, t: (n, 0, t)),
        compiler_params=pltpu.CompilerParams(
            dimension_semantics=("parallel", "parallel")),
    )(x, halos, p1["w_dw"], p1["w_pw"], b1_tot,
      p2["w_dw"], p2["w_pw"], b2_tot)


# ----------------------------- pure-JAX reference -----------------------------
def _reference_forward(x, params, *, kernel_size=3, dilations=(1, 3)):
    for d, p in zip(dilations, params):
        pad = get_padding(kernel_size, d)
        y = jnp.where(x >= 0, x, LRELU_SLOPE * x)
        C = x.shape[1]
        w_dw = p["w_dw"].reshape(C, 1, kernel_size)               # (O, I/groups, K)
        z = lax.conv_general_dilated(
            y, w_dw, window_strides=(1,), padding=[(pad, pad)],
            rhs_dilation=(d,), dimension_numbers=("NCH", "OIH", "NCH"),
            feature_group_count=C)
        z = z + p["b_dw"].reshape(1, C, 1)
        z = jnp.einsum("oi,nit->not", p["w_pw"], z) + p["b_pw"].reshape(1, C, 1)
        x = z + x
    return x


if __name__ == "__main__":
    N, C, T, K = 2, 16, 256, 3
    key = jax.random.PRNGKey(0)
    kx, *kp = jax.random.split(key, 9)

    x = jax.random.normal(kx, (N, C, T), dtype=jnp.float32)

    # Deterministic synthetic effective weights (HiFi-GAN init_weights ~ N(0, 0.01)).
    params = []
    for stage in range(2):
        kw_dw, kb_dw, kw_pw, kb_pw = kp[4 * stage:4 * stage + 4]
        params.append({
            "w_dw": 0.01 * jax.random.normal(kw_dw, (C, K), dtype=jnp.float32),
            "b_dw": 0.01 * jax.random.normal(kb_dw, (C, 1), dtype=jnp.float32),
            "w_pw": 0.01 * jax.random.normal(kw_pw, (C, C), dtype=jnp.float32),
            "b_pw": 0.01 * jax.random.normal(kb_pw, (C, 1), dtype=jnp.float32),
        })

    ref = jax.block_until_ready(_reference_forward(x, params))

    # Multi-tile path: 2 time tiles -> exercises cross-tile halos + boundary masking.
    out_tiled = jax.block_until_ready(resblock2_forward(x, params, t_tile=128))
    np.testing.assert_allclose(np.asarray(out_tiled), np.asarray(ref),
                               rtol=1e-4, atol=1e-4)

    # Auto tile size (single full-length tile at this toy T).
    out_auto = jax.block_until_ready(resblock2_forward(x, params))
    np.testing.assert_allclose(np.asarray(out_auto), np.asarray(ref),
                               rtol=1e-4, atol=1e-4)

    print("KERNEL_OK")
</pallas_src>

<mosaic_0001>
module attributes {stable_mosaic.version = 11 : i64} {
  func.func @_fused_resblock2_kernel(%arg0: i32, %arg1: i32, %arg2: memref<1x16x128xf32, #tpu.memory_space<vmem>>, %arg3: memref<1x1x16x8xf32, #tpu.memory_space<vmem>>, %arg4: memref<16x3xf32, #tpu.memory_space<vmem>>, %arg5: memref<16x16xf32, #tpu.memory_space<vmem>>, %arg6: memref<16x1xf32, #tpu.memory_space<vmem>>, %arg7: memref<16x3xf32, #tpu.memory_space<vmem>>, %arg8: memref<16x16xf32, #tpu.memory_space<vmem>>, %arg9: memref<16x1xf32, #tpu.memory_space<vmem>>, %arg10: memref<1x16x128xf32, #tpu.memory_space<vmem>>) attributes {dimension_semantics = [#tpu.dimension_semantics<parallel>, #tpu.dimension_semantics<parallel>], iteration_bounds = array<i64: 2, 2>, scalar_prefetch = 0 : i64, scratch_operands = 0 : i64, tpu.core_type = #tpu.core_type<tc>, window_params = [{transform_indices = @transform_0, window_bounds = array<i64: 1, 16, 128>}, {transform_indices = @transform_1, window_bounds = array<i64: 1, 1, 16, 8>}, {pipeline_mode = #tpu.pipeline_mode<synchronous>, transform_indices = @transform_2, window_bounds = array<i64: 16, 3>}, {pipeline_mode = #tpu.pipeline_mode<synchronous>, transform_indices = @transform_3, window_bounds = array<i64: 16, 16>}, {pipeline_mode = #tpu.pipeline_mode<synchronous>, transform_indices = @transform_4, window_bounds = array<i64: 16, 1>}, {pipeline_mode = #tpu.pipeline_mode<synchronous>, transform_indices = @transform_5, window_bounds = array<i64: 16, 3>}, {pipeline_mode = #tpu.pipeline_mode<synchronous>, transform_indices = @transform_6, window_bounds = array<i64: 16, 16>}, {pipeline_mode = #tpu.pipeline_mode<synchronous>, transform_indices = @transform_7, window_bounds = array<i64: 16, 1>}, {transform_indices = @transform_8, window_bounds = array<i64: 1, 16, 128>}]} {
    %c0 = arith.constant 0 : index
    %c0_0 = arith.constant 0 : index
    %c0_1 = arith.constant 0 : index
    %0 = vector.load %arg2[%c0, %c0_0, %c0_1] : memref<1x16x128xf32, #tpu.memory_space<vmem>>, vector<1x16x128xf32>
    %1 = vector.shape_cast %0 : vector<1x16x128xf32> to vector<16x128xf32>
    %c0_2 = arith.constant 0 : index
    %c0_3 = arith.constant 0 : index
    %c0_4 = arith.constant 0 : index
    %c0_5 = arith.constant 0 : index
    %2 = vector.load %arg3[%c0_2, %c0_3, %c0_4, %c0_5] : memref<1x1x16x8xf32, #tpu.memory_space<vmem>>, vector<1x1x16x8xf32>
    %3 = vector.shape_cast %2 : vector<1x1x16x8xf32> to vector<16x8xf32>
    %4 = vector.extract_strided_slice %3 {offsets = [0, 0], sizes = [16, 4], strides = [1, 1]} : vector<16x8xf32> to vector<16x4xf32>
    %5 = vector.extract_strided_slice %3 {offsets = [0, 4], sizes = [16, 4], strides = [1, 1]} : vector<16x8xf32> to vector<16x4xf32>
    %6 = tpu.concatenate %4, %1, %5 in 1 : vector<16x4xf32>, vector<16x128xf32>, vector<16x4xf32> -> vector<16x136xf32>
    %cst = arith.constant 0.000000e+00 : f32
    %7 = vector.broadcast %cst : f32 to vector<16x136xf32>
    %8 = arith.cmpf oge, %6, %7 : vector<16x136xf32>
    %cst_6 = arith.constant 1.000000e-01 : f32
    %9 = vector.broadcast %cst_6 : f32 to vector<16x136xf32>
    %10 = arith.mulf %9, %6 : vector<16x136xf32>
    %11 = arith.select %8, %6, %10 : vector<16x136xi1>, vector<16x136xf32>
    %c0_7 = arith.constant 0 : index
    %c0_8 = arith.constant 0 : index
    %12 = vector.load %arg4[%c0_7, %c0_8] : memref<16x3xf32, #tpu.memory_space<vmem>>, vector<16x3xf32>
    %13 = vector.extract_strided_slice %12 {offsets = [0, 0], sizes = [16, 1], strides = [1, 1]} : vector<16x3xf32> to vector<16x1xf32>
    %14 = vector.extract_strided_slice %11 {offsets = [0, 0], sizes = [16, 134], strides = [1, 1]} : vector<16x136xf32> to vector<16x134xf32>
    %15 = vector.broadcast %13 : vector<16x1xf32> to vector<16x134xf32>
    %16 = arith.mulf %15, %14 : vector<16x134xf32>
    %17 = vector.extract_strided_slice %12 {offsets = [0, 1], sizes = [16, 1], strides = [1, 1]} : vector<16x3xf32> to vector<16x1xf32>
    %18 = vector.extract_strided_slice %11 {offsets = [0, 1], sizes = [16, 134], strides = [1, 1]} : vector<16x136xf32> to vector<16x134xf32>
    %19 = vector.broadcast %17 : vector<16x1xf32> to vector<16x134xf32>
    %20 = arith.mulf %19, %18 : vector<16x134xf32>
    %21 = arith.addf %16, %20 : vector<16x134xf32>
    %22 = vector.extract_strided_slice %12 {offsets = [0, 2], sizes = [16, 1], strides = [1, 1]} : vector<16x3xf32> to vector<16x1xf32>
    %23 = vector.extract_strided_slice %11 {offsets = [0, 2], sizes = [16, 134], strides = [1, 1]} : vector<16x136xf32> to vector<16x134xf32>
    %24 = vector.broadcast %22 : vector<16x1xf32> to vector<16x134xf32>
    %25 = arith.mulf %24, %23 : vector<16x134xf32>
    %26 = arith.addf %21, %25 : vector<16x134xf32>
    %c0_9 = arith.constant 0 : index
    %c0_10 = arith.constant 0 : index
    %27 = vector.load %arg5[%c0_9, %c0_10] : memref<16x16xf32, #tpu.memory_space<vmem>>, vector<16x16xf32>
    %cst_11 = arith.constant dense<0.000000e+00> : vector<16x134xf32>
    %28 = tpu.matmul %27, %26, %cst_11 {dimension_numbers = #tpu.dot_dimension_numbers<[1], [0], [0], [1], [0, 0, 1, 1], [], []>} : vector<16x16xf32>, vector<16x134xf32>, vector<16x134xf32> -> vector<16x134xf32>
    %c0_12 = arith.constant 0 : index
    %c0_13 = arith.constant 0 : index
    %29 = vector.load %arg6[%c0_12, %c0_13] : memref<16x1xf32, #tpu.memory_space<vmem>>, vector<16x1xf32>
    %30 = vector.broadcast %29 : vector<16x1xf32> to vector<16x134xf32>
    %31 = arith.addf %28, %30 : vector<16x134xf32>
    %32 = vector.extract_strided_slice %6 {offsets = [0, 1], sizes = [16, 134], strides = [1, 1]} : vector<16x136xf32> to vector<16x134xf32>
    %33 = arith.addf %31, %32 : vector<16x134xf32>
    %cst_14 = arith.constant 0.000000e+00 : f32
    %34 = vector.broadcast %cst_14 : f32 to vector<16x134xf32>
    %35 = arith.cmpf oge, %33, %34 : vector<16x134xf32>
    %cst_15 = arith.constant 1.000000e-01 : f32
    %36 = vector.broadcast %cst_15 : f32 to vector<16x134xf32>
    %37 = arith.mulf %36, %33 : vector<16x134xf32>
    %38 = arith.select %35, %33, %37 : vector<16x134xi1>, vector<16x134xf32>
    %c128_i32 = arith.constant 128 : i32
    %39 = arith.muli %arg1, %c128_i32 : i32
    %40 = tpu.iota {dimensions = array<i32: 1>} : vector<16x134xi32>
    %c3_i32 = arith.constant 3 : i32
    %41 = arith.subi %39, %c3_i32 : i32
    %42 = vector.broadcast %41 : i32 to vector<16x134xi32>
    %43 = arith.addi %40, %42 : vector<16x134xi32>
    %c0_i32 = arith.constant 0 : i32
    %44 = vector.broadcast %c0_i32 : i32 to vector<16x134xi32>
    %45 = arith.cmpi sge, %43, %44 : vector<16x134xi32>
    %c256_i32 = arith.constant 256 : i32
    %46 = vector.broadcast %c256_i32 : i32 to vector<16x134xi32>
    %47 = arith.cmpi slt, %43, %46 : vector<16x134xi32>
    %48 = arith.andi %45, %47 : vector<16x134xi1>
    %cst_16 = arith.constant 0.000000e+00 : f32
    %49 = vector.broadcast %cst_16 : f32 to vector<16x134xf32>
    %50 = arith.select %48, %38, %49 : vector<16x134xi1>, vector<16x134xf32>
    %c0_17 = arith.constant 0 : index
    %c0_18 = arith.constant 0 : index
    %51 = vector.load %arg7[%c0_17, %c0_18] : memref<16x3xf32, #tpu.memory_space<vmem>>, vector<16x3xf32>
    %52 = vector.extract_strided_slice %51 {offsets = [0, 0], sizes = [16, 1], strides = [1, 1]} : vector<16x3xf32> to vector<16x1xf32>
    %53 = vector.extract_strided_slice %50 {offsets = [0, 0], sizes = [16, 128], strides = [1, 1]} : vector<16x134xf32> to vector<16x128xf32>
    %54 = vector.broadcast %52 : vector<16x1xf32> to vector<16x128xf32>
    %55 = arith.mulf %54, %53 : vector<16x128xf32>
    %56 = vector.extract_strided_slice %51 {offsets = [0, 1], sizes = [16, 1], strides = [1, 1]} : vector<16x3xf32> to vector<16x1xf32>
    %57 = vector.extract_strided_slice %50 {offsets = [0, 3], sizes = [16, 128], strides = [1, 1]} : vector<16x134xf32> to vector<16x128xf32>
    %58 = vector.broadcast %56 : vector<16x1xf32> to vector<16x128xf32>
    %59 = arith.mulf %58, %57 : vector<16x128xf32>
    %60 = arith.addf %55, %59 : vector<16x128xf32>
    %61 = vector.extract_strided_slice %51 {offsets = [0, 2], sizes = [16, 1], strides = [1, 1]} : vector<16x3xf32> to vector<16x1xf32>
    %62 = vector.extract_strided_slice %50 {offsets = [0, 6], sizes = [16, 128], strides = [1, 1]} : vector<16x134xf32> to vector<16x128xf32>
    %63 = vector.broadcast %61 : vector<16x1xf32> to vector<16x128xf32>
    %64 = arith.mulf %63, %62 : vector<16x128xf32>
    %65 = arith.addf %60, %64 : vector<16x128xf32>
    %c0_19 = arith.constant 0 : index
    %c0_20 = arith.constant 0 : index
    %66 = vector.load %arg8[%c0_19, %c0_20] : memref<16x16xf32, #tpu.memory_space<vmem>>, vector<16x16xf32>
    %cst_21 = arith.constant dense<0.000000e+00> : vector<16x128xf32>
    %67 = tpu.matmul %66, %65, %cst_21 {dimension_numbers = #tpu.dot_dimension_numbers<[1], [0], [0], [1], [0, 0, 1, 1], [], []>} : vector<16x16xf32>, vector<16x128xf32>, vector<16x128xf32> -> vector<16x128xf32>
    %c0_22 = arith.constant 0 : index
    %c0_23 = arith.constant 0 : index
    %68 = vector.load %arg9[%c0_22, %c0_23] : memref<16x1xf32, #tpu.memory_space<vmem>>, vector<16x1xf32>
    %69 = vector.broadcast %68 : vector<16x1xf32> to vector<16x128xf32>
    %70 = arith.addf %67, %69 : vector<16x128xf32>
    %71 = vector.extract_strided_slice %33 {offsets = [0, 3], sizes = [16, 128], strides = [1, 1]} : vector<16x134xf32> to vector<16x128xf32>
    %72 = arith.addf %70, %71 : vector<16x128xf32>
    %c0_24 = arith.constant 0 : index
    %c0_25 = arith.constant 0 : index
    %c0_26 = arith.constant 0 : index
    %73 = vector.load %arg10[%c0_24, %c0_25, %c0_26] : memref<1x16x128xf32, #tpu.memory_space<vmem>>, vector<1x16x128xf32>
    %74 = vector.shape_cast %73 : vector<1x16x128xf32> to vector<16x128xf32>
    %75 = vector.shape_cast %72 : vector<16x128xf32> to vector<1x16x128xf32>
    tpu.vector_store %arg10[%c0_24, %c0_25, %c0_26], %75 {strides = array<i32>} : memref<1x16x128xf32, #tpu.memory_space<vmem>>, vector<1x16x128xf32>,
    return
  }
  func.func @transform_0(%arg0: i32, %arg1: i32) -> (i32, i32, i32) {
    %c0_i32 = arith.constant 0 : i32
    %c0_i32_0 = arith.constant 0 : i32
    return %arg0, %c0_i32, %arg1 : i32, i32, i32
  }
  func.func @transform_1(%arg0: i32, %arg1: i32) -> (i32, i32, i32, i32) {
    %c0_i32 = arith.constant 0 : i32
    %c0_i32_0 = arith.constant 0 : i32
    %c0_i32_1 = arith.constant 0 : i32
    return %arg0, %arg1, %c0_i32, %c0_i32_0 : i32, i32, i32, i32
  }
  func.func @transform_2(%arg0: i32, %arg1: i32) -> (i32, i32) {
    %c0_i32 = arith.constant 0 : i32
    %c0_i32_0 = arith.constant 0 : i32
    %c0_i32_1 = arith.constant 0 : i32
    return %c0_i32, %c0_i32_0 : i32, i32
  }
  func.func @transform_3(%arg0: i32, %arg1: i32) -> (i32, i32) {
    %c0_i32 = arith.constant 0 : i32
    %c0_i32_0 = arith.constant 0 : i32
    %c0_i32_1 = arith.constant 0 : i32
    return %c0_i32, %c0_i32_0 : i32, i32
  }
  func.func @transform_4(%arg0: i32, %arg1: i32) -> (i32, i32) {
    %c0_i32 = arith.constant 0 : i32
    %c0_i32_0 = arith.constant 0 : i32
    %c0_i32_1 = arith.constant 0 : i32
    return %c0_i32, %c0_i32_0 : i32, i32
  }
  func.func @transform_5(%arg0: i32, %arg1: i32) -> (i32, i32) {
    %c0_i32 = arith.constant 0 : i32
    %c0_i32_0 = arith.constant 0 : i32
    %c0_i32_1 = arith.constant 0 : i32
    return %c0_i32, %c0_i32_0 : i32, i32
  }
  func.func @transform_6(%arg0: i32, %arg1: i32) -> (i32, i32) {
    %c0_i32 = arith.constant 0 : i32
    %c0_i32_0 = arith.constant 0 : i32
    %c0_i32_1 = arith.constant 0 : i32
    return %c0_i32, %c0_i32_0 : i32, i32
  }
  func.func @transform_7(%arg0: i32, %arg1: i32) -> (i32, i32) {
    %c0_i32 = arith.constant 0 : i32
    %c0_i32_0 = arith.constant 0 : i32
    %c0_i32_1 = arith.constant 0 : i32
    return %c0_i32, %c0_i32_0 : i32, i32
  }
  func.func @transform_8(%arg0: i32, %arg1: i32) -> (i32, i32, i32) {
    %c0_i32 = arith.constant 0 : i32
    %c0_i32_0 = arith.constant 0 : i32
    return %arg0, %c0_i32, %arg1 : i32, i32, i32
  }
}

</mosaic_0001>

<bundles_post_ra>
// kernel: tpu_custom_call.1
= control target key start
LH: loop header
LB: loop body
LE: loop exit
PB: predicated region body
PF: predicated region fallthrough
CT: control target
= control target key end

     0   :  { %13 = vsyncpa [#allocation4], 0  ;;  %s1503_s0 = inlined_call_operand.vmem [shape: f32[2,16,256], index: 0, kind: input, shape index: {}]   ;;  %s1504_s1 = inlined_call_operand.vmem [shape: f32[2,2,16,8], index: 1, kind: input, shape index: {}]   ;;  %s1505_s2 = inlined_call_operand.vmem [shape: f32[16,3], index: 2, kind: input, shape index: {}]   ;;  %s1506_s3 = inlined_call_operand.vmem [shape: f32[16,16], index: 3, kind: input, shape index: {}]   ;;  %s1507_s4 = inlined_call_operand.vmem [shape: f32[16,1], index: 4, kind: input, shape index: {}]   ;;  %s1508_s5 = inlined_call_operand.vmem [shape: f32[16,3], index: 5, kind: input, shape index: {}]   ;;  %s1509_s6 = inlined_call_operand.vmem [shape: f32[16,16], index: 6, kind: input, shape index: {}]   ;;  %s1510_s7 = inlined_call_operand.vmem [shape: f32[16,1], index: 7, kind: input, shape index: {}]   ;;  %s1511_s8 = inlined_call_operand.hbm [shape: f32[2,16,256], index: 8, kind: output, shape index: {}]  }
   0x1   :  { %15 = vsyncpa [#allocation4 + $0x1], 0  ;;  %s1250_s27 = smov 0   ;;  %s1252_s28 = smov 0  }
   0x2   :  { %s1254_s29 = smov 0   ;;  %s1256_s30 = smov 0  }
   0x3   :  { %s1258_s9 = smov 0   ;;  %s1260_s10 = smov 0  }
   0x4   :  { %s1262_s11 = smov 0   ;;  %s1264_s12 = smov 0  }
   0x5 LB: > { %s970_s13 = sadd.s32 4294967295, %s1190_s12   ;;  %s971_s14 = sadd.s32 4294967294, %s1190_s12   ;;  %s1190_s12 = sphi %s1264_s12, %s21_s12   ;;  %s1186_s11 = sphi %s1262_s11, %s1533_s11   ;;  %s1182_s10 = sphi %s1260_s10, %s1532_s10   ;;  %s1178_s9 = sphi %s1258_s9, %s1531_s9   ;;  %s1174_s30 = sphi %s1256_s30, %s1530_s30   ;;  %s1170_s29 = sphi %s1254_s29, %s1529_s29   ;;  %s1166_s28 = sphi %s1252_s28, %s1528_s28   ;;  %s1162_s27 = sphi %s1250_s27, %s1527_s27  }
   0x6   : > { %s30_s15 = sadd.s32 1, %s1182_s10  ;;  %s33_s16 = sadd.s32 1, %s1186_s11 }
   0x7   : > { %p31_p0 = scmp.ge.s32.totalorder %s30_s15, 2  ;;  %p49_p1 = scmp.ne.s32.totalorder %s1170_s29, %s1166_s28 }
   0x8   : > { %p50_p2 = scmp.eq.s32.totalorder %s1190_s12, 0  ;;  %p235_p5 = scmp.eq.s32.totalorder %s970_s13, 3 }
   0x9   : > { %s1535_s15 = smov (%p31_p0, %s30_s15), 0  ;;  %s1537_s16 = smov (!%p31_p0, %s33_s16), %s1186_s11 }
   0xa   : > { %1515 = sst [smem:[#allocation6_spill]] %s1535_s15  ;;  %s38_s17 = ssub.s32 %s1182_s10, %s1535_s15 }
   0xb   : > { %p1302_p3 = por %p50_p2, %p49_p1  ;;  %p35_p4 = scmp.ge.s32.totalorder %s1537_s16, 2 }
   0xc   : > { %p240_p6 = scmp.ne.s32.totalorder %s1166_s28, %s1162_s27  ;;  %p241_p7 = scmp.eq.s32.totalorder %s971_s14, 3 }
   0xd   : > { %s1539_s16 = smov (%p35_p4, %s1537_s16), 0  ;;  %p1310_p8 = por %p235_p5, %p49_p1 }
   0xe   : > { %1517 = sst [smem:[#allocation7_spill]] %s1539_s16  ;;  %p1314_p9 = por %p241_p7, %p240_p6 }
   0xf   : > { %s37_s21 = ssub.s32 %s1186_s11, %s1539_s16  ;;  %s42_s23 = sadd.s32 1, %s1170_s29 }
  0x10   : > { %s39_s22 = sor.u32 %s38_s17, %s37_s21  ;;  %p973_p11 = scmp.ge.s32.totalorder %s1190_s12, 4 }
  0x11   : > { %p40_p10 = scmp.eq.s32.totalorder %s39_s22, 0 }
  0x12   : > { %275 = sbr.rel (%p973_p11) target bundleno = 30 (0x1e), region = 40 }
  0x13   : > { %s1322_s24 = scalar_select %p40_p10, %s1170_s29, %s42_s23  }
  0x17   : > { %278 = sbr.rel (!%p1302_p3) target bundleno = 30 (0x1e), region = 44  ;;  %s280_s25 = sand.u32 (%p1302_p3), 1, %s1170_s29  }
  0x18   : > { %s975_s26 = sshll.u32 (%p1302_p3), %s1186_s11, 2  ;;  %s974_s13 = sshll.u32 (%p1302_p3), %s280_s25, 4 }
  0x19   : > { %s284_s14 = sadd.s32 (%p1302_p3), %s1182_s10, %s975_s26  ;;  %s282_s22 = scalar_lea.vmem (%p1302_p3), [#allocation2], %s974_s13 }
  0x1a   : > { %s976_s15 = sshll.u32 (%p1302_p3), %s284_s14, 3 }
  0x1b   : > { %s286_s21 = scalar_lea.vmem (%p1302_p3), %s1503_s0, %s976_s15 }
  0x1c   : > { %v317_v0 = vld [vmem:[%s286_s21] sm:$0xff]  ;;  %v319_v1 = vld [vmem:[%s286_s21 + $0x10] sm:$0xff] }
  0x1d   : > { %318 = vst [vmem:[%s282_s22] sm:$0xff] %v317_v0  ;;  %320 = vst [vmem:[%s282_s22 + $0x8] sm:$0xff] %v319_v1 }
  0x1e PF: > { %p977_p12 = scmp.ge.s32.totalorder %s1190_s12, 1  ;;  %p337_p13 = scmp.lt.s32.totalorder %s1190_s12, 5 }
  0x20   : > { %p338_p0 = pnand %p977_p12, %p337_p13 }
  0x21   : > { %s1514_s25 = sand.u32 (!%p338_p0), 1, %s1166_s28   ;;  %s1194_s14 = smov (!%p338_p0), 4  }
  0x22   : > { %341 = sbr.rel (%p338_p0) target bundleno = 858 (0x35a), region = 86  ;;  %s1346_s26 = sshll.u32 (!%p338_p0), %s1514_s25, 4 }
  0x23   : > { %s346_s13 = scalar_lea.vmem (!%p338_p0), [#allocation2], %s1346_s26  ;;  %p386_p1 = scmp.lt.s32.totalorder (!%p338_p0), %s1178_s9, 1 }
  0x24   : > { %p388_p2 = scmp.lt.s32.totalorder (!%p338_p0), %s1174_s30, 1  ;;  %s1196_s25 = smov (!%p338_p0), 127  }
  0x25   : > { %s385_s16 = scalar_lea.vmem (!%p338_p0), [#allocation3], %s1346_s26 }
  0x27   : > { %v425_v2 = vld [vmem:[%s1505_s2 + $0x8] sm:$0xff]  ;;  %v424_v3 = vld [vmem:[%s1505_s2] sm:$0xff]  ;;  %v1192_v4 = vmov 1   ;;  %v1193_v6 = vmov 2   ;;  %v1195_v8 = vmov 0   ;;  %s387_s17 = scalar_select %p386_p1, %s1178_s9, 1 }
  0x28   : > { %1089 = vset.pattern.permute.xlu1 %v1192_v4  ;;  %1088 = vset.pattern.permute.xlu0 %v1192_v4  ;;  %v396_v5 = vld [vmem:[%s346_s13 + $0x8] sm:$0xff]  ;;  %v395_v7 = vld [vmem:[%s346_s13] sm:$0xff]  ;;  %s389_s21 = scalar_select %p388_p2, %s1174_s30, 1  ;;  %vm407_vm0 = vcmask 31744   ;;  %v1197_v31 = vmov 0.0   ;;  %vm464_vm5 = vcmask 1039360  }
  0x29   : > { %445 = vperm.xlu0 %1088, %v425_v2   ;;  %441 = vperm.xlu1 %1089, %v424_v3   ;;  %s981_s18 = sshll.u32 %s387_s17, 2  ;;  %v512_v38 = vld [vmem:[%s1507_s4] sm:$0xff]  ;;  %v513_v39 = vld [vmem:[%s1507_s4 + $0x8] sm:$0xff]  ;;  %vm499_vm6 = vcmask 1031168   ;;  %vm524_vm7 = vcmask 130048  }
  0x2a   : > { %s980_s22 = sshll.u32 %s389_s21, 1  ;;  %595 = vmatprep.mubr.f32.mxu0 %v1197_v31  ;;  %v661_v40 = vld [vmem:[%s1508_s5 + $0x8] sm:$0xff]  ;;  %v660_v41 = vld [vmem:[%s1508_s5] sm:$0xff] }
  0x2b   : > { %s392_s23 = sadd.s32 %s981_s18, %s980_s22  ;;  %s985_s22 = sshll.u32 %s1174_s30, 7 }
  0x2c   : > { %s982_s15 = sshll.u32 %s392_s23, 3  ;;  %s986_s18 = sadd.s32 4294967293, %s985_s22 }
  0x2d   : > { %1090 = vset.pattern.permute.xlu1 %v1193_v6  ;;  %403 = vrot.lane.b32.xlu0 %v396_v5, %s1194_s14  ;;  %s394_s13 = scalar_lea.vmem %s1504_s1, %s982_s15  ;;  %v511_v5 = vld [vmem:[%s1506_s3 + $0x8] sm:$0xff]  ;;  %s1199_s23 = smov 125  }
  0x2e   : > { %480 = vperm.xlu1 %1090, %v425_v2   ;;  %1091 = vset.pattern.permute.xlu0 %v1195_v8  ;;  %v398_v10 = vld [vmem:[%s394_s13 + $0x8] sm:$0xff]  ;;  %v397_v14 = vld [vmem:[%s394_s13] sm:$0xff]  ;;  %s1200_s13 = smov 122   ;;  %s1201_s22 = smov [#allocation3]  }
  0x31   : > { %401 = vrot.lane.b32.xlu0 %v395_v7, %s1194_s14  ;;  %s1198_s14 = smov 126  }
  0x32   : > { %476 = vperm.xlu1 %1090, %v424_v3  }
  0x35   : > { %433 = vperm.xlu0 %1091, %v425_v2  }
  0x36   : > { %1092 = vset.pattern.permute.xlu1 %v1195_v8 }
  0x37   : > { %428 = vperm.xlu1 %1092, %v424_v3  }
  0xa4   : > { %v446_v9 = vpop.permute.xlu0 %445  ;;  %v442_v22 = vpop.permute.xlu1 %441 }
  0xa8   : > { %v404_v11 = vpop.permute.xlu0 %403 }
  0xa9   : > { %v409_v12 = vsel %vm407_vm0, %v398_v10, %v404_v11  ;;  %v411_v13 = vsel %vm407_vm0, %v404_v11, %v398_v10  ;;  %v481_v32 = vpop.permute.xlu1 %480 }
  0xaa   : > { %vm414_vm1 = vcmp.ge.f32.partialorder %v409_v12, 0.0  ;;  %vm415_vm2 = vcmp.ge.f32.partialorder %v411_v13, 0.0  ;;  %v418_v15 = vmul.f32 0.1, %v409_v12  ;;  %v419_v16 = vmul.f32 0.1, %v411_v13 }
  0xac   : > { %v1359_v17 = vsel %vm414_vm1, %v409_v12, %v418_v15  ;;  %v423_v18 = vsel %vm415_vm2, %v411_v13, %v419_v16  ;;  %v402_v19 = vpop.permute.xlu0 %401  ;;  %vm698_vm2 = vcmask 1022976  }
  0xad   : > { %v408_v20 = vsel %vm407_vm0, %v397_v14, %v402_v19  ;;  %v410_v21 = vsel %vm407_vm0, %v402_v19, %v397_v14  ;;  %v450_v25 = vmul.f32 %v446_v9, %v1359_v17  ;;  %v451_v26 = vmul.f32 %v446_v9, %v423_v18  ;;  %v477_v35 = vpop.permute.xlu1 %476 }
  0xae   : > { %vm412_vm3 = vcmp.ge.f32.partialorder %v408_v20, 0.0  ;;  %vm413_vm4 = vcmp.ge.f32.partialorder %v410_v21, 0.0  ;;  %v416_v23 = vmul.f32 0.1, %v408_v20  ;;  %v417_v24 = vmul.f32 0.1, %v410_v21 }
  0xaf   : > { %460 = vrot.lane.b32.xlu1 %v450_v25, %s1196_s25  ;;  %462 = vrot.lane.b32.xlu0 %v451_v26, %s1196_s25  ;;  %v485_v33 = vmul.f32 %v481_v32, %v1359_v17  ;;  %v486_v34 = vmul.f32 %v481_v32, %v423_v18 }
  0xb0   : > { %v420_v27 = vsel %vm412_vm3, %v408_v20, %v416_v23  ;;  %v421_v28 = vsel %vm413_vm4, %v410_v21, %v417_v24  ;;  %v434_v42 = vpop.permute.xlu0 %433  ;;  %vm729_vm3 = vcmask 998400  }
  0xb1   : > { %v449_v29 = vmul.f32 %v442_v22, %v421_v28  ;;  %v448_v30 = vmul.f32 %v442_v22, %v420_v27  ;;  %v483_v36 = vmul.f32 %v477_v35, %v420_v27  ;;  %v484_v37 = vmul.f32 %v477_v35, %v421_v28 }
  0xb2   : > { %v429_v43 = vpop.permute.xlu1 %428  ;;  %v439_v48 = vmul.f32 %v434_v42, %v423_v18  ;;  %v438_v50 = vmul.f32 %v434_v42, %v1359_v17 }
  0xb3   : > { %458 = vrot.lane.b32.xlu0 %v449_v29, %s1196_s25  ;;  %456 = vrot.lane.b32.xlu1 %v448_v30, %s1196_s25  ;;  %v437_v55 = vmul.f32 %v429_v43, %v421_v28  ;;  %v436_v59 = vmul.f32 %v429_v43, %v420_v27 }
  0xb7   : > { %497 = vrot.lane.b32.xlu0 %v486_v34, %s1198_s14  ;;  %495 = vrot.lane.b32.xlu1 %v485_v33, %s1198_s14 }
  0xbb   : > { %493 = vrot.lane.b32.xlu0 %v484_v37, %s1198_s14  ;;  %491 = vrot.lane.b32.xlu1 %v483_v36, %s1198_s14  ;;  %s1524_s14 = sand.u32 1, %s1166_s28  }
  0xbc   : > { %s1452_s17 = scalar_lea.sflag [#allocation4], %s1524_s14 }
  0xbf   : > { %516 = vperm.xlu0 %1091, %v512_v38   ;;  %521 = vperm.xlu1 %1092, %v513_v39  }
  0xc3   : > { %618 = vrot.lane.b32.xlu0 %v411_v13, %s1196_s25  ;;  %616 = vrot.lane.b32.xlu1 %v409_v12, %s1196_s25  ;;  %v647_v12 = vstv %s986_s18  ;;  %s1102_s18 = sshll.u32 %s1201_s22, 4  ;;  %s1103_s18 = int_to_ptr.vmem [resolvable:$false] %s1102_s18 }
  0xc4   : > { %1093 = vset.pattern.permute.xlu1 %v1192_v4  ;;  %1094 = vset.pattern.permute.xlu0 %v1192_v4  ;;  %v510_v4 = vld [vmem:[%s1506_s3] sm:$0xff] }
  0xc7   : > { %614 = vrot.lane.b32.xlu0 %v410_v21, %s1196_s25  ;;  %612 = vrot.lane.b32.xlu1 %v408_v20, %s1196_s25 }
  0xcb   : > { %679 = vperm.xlu1 %1093, %v661_v40   ;;  %675 = vperm.xlu0 %1094, %v660_v41  }
  0xcf   : > { %1095 = vset.pattern.permute.xlu1 %v1193_v6  ;;  %1096 = vset.pattern.permute.xlu0 %v1195_v8 }
  0xd0   : > { %710 = vperm.xlu1 %1095, %v661_v40   ;;  %669 = vperm.xlu0 %1096, %v661_v40  }
  0xd4   : > { %706 = vperm.xlu1 %1095, %v660_v41  }
  0xd8   : > { %1097 = vset.pattern.permute.xlu1 %v1195_v8  ;;  %v643_v8 = vlaneseq }
  0xd9   : > { %664 = vperm.xlu1 %1097, %v660_v41  }
  0xda   : > { %v644_v9 = vand.u32 127, %v643_v8 }
  0xdc   : > { %v645_v13 = vadd.s32 128, %v644_v9  ;;  %v648_v14 = vadd.s32 %v647_v12, %v644_v9 }
  0xde   : > { %v649_v18 = vadd.s32 %v647_v12, %v645_v13  ;;  %vm650_vm8 = vcmp.ge.s32.totalorder %v648_v14, 0  ;;  %vm652_vm9 = vcmp.lt.s32.totalorder %v648_v14, 256 }
  0xdf   : > { %vm1397_vm12 = vmand %vm650_vm8, %vm652_vm9 }
  0xe0   : > { %vm651_vm10 = vcmp.ge.s32.totalorder %v649_v18, 0  ;;  %vm653_vm11 = vcmp.lt.s32.totalorder %v649_v18, 256 }
  0xe1   : > { %vm1402_vm14 = vmand %vm651_vm10, %vm653_vm11 }
 0x121   : > { %v461_v44 = vpop.permute.xlu1 %460  ;;  %v463_v45 = vpop.permute.xlu0 %462 }
 0x122   : > { %v466_v49 = vsel %vm464_vm5, %v461_v44, %v463_v45  ;;  %v474_v51 = vadd.f32 %v463_v45, %v439_v48 }
 0x123   : > { %v473_v52 = vadd.f32 %v466_v49, %v438_v50 }
 0x125   : > { %v457_v46 = vpop.permute.xlu1 %456  ;;  %v459_v47 = vpop.permute.xlu0 %458 }
 0x126   : > { %v465_v56 = vsel %vm464_vm5, %v457_v46, %v459_v47  ;;  %v472_v61 = vadd.f32 %v459_v47, %v437_v55 }
 0x127   : > { %v471_v62 = vadd.f32 %v465_v56, %v436_v59  ;;  %v738_v59 = vld [vmem:[%s1510_s7] sm:$0xff] }
 0x129   : > { %v496_v53 = vpop.permute.xlu1 %495  ;;  %v498_v54 = vpop.permute.xlu0 %497 }
 0x12a   : > { %v501_v57 = vsel %vm499_vm6, %v496_v53, %v498_v54  ;;  %v509_v58 = vadd.f32 %v498_v54, %v474_v51  ;;  %v736_v53 = vld [vmem:[%s1509_s6] sm:$0xff] }
 0x12b   : > { %v508_v60 = vadd.f32 %v501_v57, %v473_v52  ;;  %1002 = vmatprep.mubr.msk.f32.mxu1 %vm524_vm7, %v736_v53 }
 0x12c   : > { %559 = vmatprep.subr.mxu0 %v509_v58 }
 0x12d   : > { %v492_v63 = vpop.permute.xlu1 %491  ;;  %560 = vmatpush1.msra.mxu0 %v508_v60  ;;  %v494_v0 = vpop.permute.xlu0 %493  ;;  %v739_v60 = vld [vmem:[%s1510_s7 + $0x8] sm:$0xff] }
 0x12e   : > { %v500_v1 = vsel %vm499_vm6, %v492_v63, %v494_v0  ;;  %v507_v2 = vadd.f32 %v494_v0, %v472_v61 }
 0x12f   : > { %v506_v3 = vadd.f32 %v500_v1, %v471_v62 }
 0x130   : > { %561 = vmatprep.subr.mxu0 %v507_v2 }
 0x131   : > { %562 = vmatpush1.msra.mxu0 %v506_v3 }
 0x132   : > { %983 = vmatmul.mubr.msk.f32.vlgmr.msra.gmra.mxu0 %vm524_vm7, %v510_v4 }
 0x133   : > { %601 = vmatprep.mubr.f32.mxu0 %v1197_v31 }
 0x136   : > { %984 = vmatmul.mubr.msk.f32.gmra.mxu0 %vm524_vm7, %v511_v5 }
 0x13a   : > { %v522_v6 = vpop.permute.xlu1 %521  ;;  %v517_v7 = vpop.permute.xlu0 %516 }
 0x13e   : > { %v617_v10 = vpop.permute.xlu1 %616  ;;  %v619_v11 = vpop.permute.xlu0 %618 }
 0x13f   : > { %v621_v29 = vsel %vm464_vm5, %v617_v10, %v619_v11 }
 0x142   : > { %v613_v15 = vpop.permute.xlu1 %612  ;;  %v615_v16 = vpop.permute.xlu0 %614 }
 0x143   : > { %v620_v20 = vsel %vm464_vm5, %v613_v15, %v615_v16 }
 0x146   : > { %v676_v31 = vpop.permute.xlu0 %675  ;;  %v680_v38 = vpop.permute.xlu1 %679 }
 0x14b   : > { %v711_v50 = vpop.permute.xlu1 %710  ;;  %v670_v62 = vpop.permute.xlu0 %669 }
 0x14f   : > { %v707_v56 = vpop.permute.xlu1 %706 }
 0x154   : > { %v665_v61 = vpop.permute.xlu1 %664 }
 0x1f2   : > { %v597_v17 = vpop.f32.mrf.mxu0 }
 0x1f3   : > { %v598_v19 = vadd.f32 %v597_v17, %v517_v7  ;;  %v737_v17 = vld [vmem:[%s1509_s6 + $0x8] sm:$0xff] }
 0x1f4   : > { %v599_v21 = vpop.f32.mrf.mxu0 }
 0x1f5   : > { %v626_v22 = vadd.f32 %v620_v20, %v598_v19  ;;  %v600_v23 = vadd.f32 %v599_v21, %v517_v7 }
 0x1f6   : > { %v603_v24 = vpop.f32.mrf.mxu0 }
 0x1f7   : > { %v627_v25 = vadd.f32 %v615_v16, %v600_v23  ;;  %vm630_vm13 = vcmp.ge.f32.partialorder %v626_v22, 0.0  ;;  %v634_v27 = vmul.f32 0.1, %v626_v22  ;;  %v604_v28 = vadd.f32 %v603_v24, %v522_v6 }
 0x1f8   : > { %v605_v30 = vpop.f32.mrf.mxu0 }
 0x1f9   : > { %vm631_vm15 = vcmp.ge.f32.partialorder %v627_v25, 0.0  ;;  %v635_v33 = vmul.f32 0.1, %v627_v25  ;;  %v638_v34 = vsel %vm630_vm13, %v626_v22, %v634_v27  ;;  %v628_v35 = vadd.f32 %v621_v29, %v604_v28 }
 0x1fa   : > { %v656_v36 = vsel %vm1397_vm12, %v638_v34, 0.0  ;;  %v606_v37 = vadd.f32 %v605_v30, %v522_v6 }
 0x1fb   : > { %v639_v39 = vsel %vm631_vm15, %v627_v25, %v635_v33  ;;  %v682_v40 = vmul.f32 %v676_v31, %v656_v36  ;;  %vm632_vm0 = vcmp.ge.f32.partialorder %v628_v35, 0.0  ;;  %v636_v43 = vmul.f32 0.1, %v628_v35 }
 0x1fc   : > { %v657_v41 = vsel %vm1402_vm14, %v639_v39, 0.0  ;;  %v629_v42 = vadd.f32 %v619_v11, %v606_v37  ;;  %v713_v57 = vmul.f32 %v707_v56, %v656_v36  ;;  %v672_v10 = vmul.f32 %v665_v61, %v656_v36 }
 0x1fd   : > { %v683_v44 = vmul.f32 %v676_v31, %v657_v41  ;;  %690 = vrot.lane.b32.xlu1 %v682_v40, %s1199_s23  ;;  %v640_v45 = vsel %vm632_vm0, %v628_v35, %v636_v43  ;;  %v714_v58 = vmul.f32 %v707_v56, %v657_v41 }
 0x1fe   : > { %vm633_vm1 = vcmp.ge.f32.partialorder %v629_v42, 0.0  ;;  %v637_v46 = vmul.f32 0.1, %v629_v42  ;;  %v658_v47 = vsel %vm1397_vm12, %v640_v45, 0.0 }
 0x1ff   : > { %692 = vrot.lane.b32.xlu0 %v683_v44, %s1199_s23  ;;  %v684_v48 = vmul.f32 %v680_v38, %v658_v47  ;;  %v715_v54 = vmul.f32 %v711_v50, %v658_v47  ;;  %v673_v4 = vmul.f32 %v670_v62, %v658_v47 }
 0x200   : > { %v641_v49 = vsel %vm633_vm1, %v629_v42, %v637_v46 }
 0x201   : > { %v659_v51 = vsel %vm1402_vm14, %v641_v49, 0.0  ;;  %694 = vrot.lane.b32.xlu1 %v684_v48, %s1199_s23 }
 0x202   : > { %v685_v52 = vmul.f32 %v680_v38, %v659_v51  ;;  %v716_v55 = vmul.f32 %v711_v50, %v659_v51 }
 0x204   : > { %696 = vrot.lane.b32.xlu0 %v685_v52, %s1199_s23 }
 0x205   : > { %725 = vrot.lane.b32.xlu1 %v715_v54, %s1200_s13 }
 0x208   : > { %727 = vrot.lane.b32.xlu0 %v716_v55, %s1200_s13 }
 0x209   : > { %721 = vrot.lane.b32.xlu1 %v713_v57, %s1200_s13 }
 0x20c   : > { %723 = vrot.lane.b32.xlu0 %v714_v58, %s1200_s13  ;;  %s866_s13 = sshll.u32 %s385_s16, 4  ;;  %s1442_s13 = int_to_ptr.vmem [resolvable:$true] %s866_s13 }
 0x20d   : > { %742 = vperm.xlu1 %1097, %v738_v59   ;;  %s1098_s21 = scalar_lea.vmem %s1442_s13, 256  ;;  %p1105_p6 = scmp.lt.s32.totalorder %s1442_s13, %s1103_s18 }
 0x20e   : > { %p1099_p3 = scmp.ne.s32.totalorder %s1442_s13, %s1098_s21 }
 0x210   : > { %747 = vperm.xlu0 %1096, %v739_v60   ;;  %p1100_p4 = pnand %p1099_p3, %p1310_p8 }
 0x211   : > { %835 = vrot.lane.b32.xlu1 %v626_v22, %s1199_s23 }
 0x212   : > { %p1101_p5 = pneg %p1100_p4 }
 0x214   : > { %837 = vrot.lane.b32.xlu0 %v627_v25, %s1199_s23 }
 0x215   : > { %839 = vrot.lane.b32.xlu1 %v628_v35, %s1199_s23 }
 0x218   : > { %841 = vrot.lane.b32.xlu0 %v629_v42, %s1199_s23  ;;  %s990_s23 = sshll.u32 %s1178_s9, 2 }
 0x219   : > { %s863_s15 = sadd.s32 %s1174_s30, %s990_s23  ;;  %s1104_s23 = scalar_lea.vmem %s1103_s18, 512 }
 0x21a   : > { %s991_s25 = sshll.u32 %s863_s15, 7  ;;  %p1106_p7 = scmp.lt.s32.totalorder %s1104_s23, %s1098_s21 }
 0x21b   : > { %s1448_s26 = scalar_lea.hbm %s1511_s8, %s991_s25 }
 0x21c   : > { %p1107_p10 = por %p1106_p7, %p1105_p6 }
 0x21e   : > { %p1108_p11 = pnand %p1107_p10, %p1101_p5 }
 0x26f   : > { %v691_v63 = vpop.permute.xlu1 %690 }
 0x271   : > { %v693_v0 = vpop.permute.xlu0 %692 }
 0x272   : > { %v699_v8 = vsel %vm698_vm2, %v691_v63, %v693_v0 }
 0x273   : > { %v695_v1 = vpop.permute.xlu1 %694  ;;  %v703_v12 = vadd.f32 %v699_v8, %v672_v10 }
 0x276   : > { %v697_v2 = vpop.permute.xlu0 %696 }
 0x277   : > { %v700_v3 = vsel %vm698_vm2, %v695_v1, %v697_v2  ;;  %v726_v5 = vpop.permute.xlu1 %725 }
 0x278   : > { %v704_v6 = vadd.f32 %v700_v3, %v673_v4 }
 0x27a   : > { %v728_v7 = vpop.permute.xlu0 %727 }
 0x27b   : > { %v731_v9 = vsel %vm729_vm3, %v726_v5, %v728_v7  ;;  %v722_v13 = vpop.permute.xlu1 %721 }
 0x27c   : > { %v735_v11 = vadd.f32 %v731_v9, %v704_v6 }
 0x27e   : > { %998 = vmatprep.subr.mxu1 %v735_v11  ;;  %v724_v14 = vpop.permute.xlu0 %723 }
 0x27f   : > { %v730_v15 = vsel %vm729_vm3, %v722_v13, %v724_v14  ;;  %999 = vmatpush3.msra.mxu1 %v735_v11 }
 0x280   : > { %v734_v16 = vadd.f32 %v730_v15, %v703_v12 }
 0x282   : > { %1000 = vmatprep.subr.mxu1 %v734_v16 }
 0x283   : > { %1001 = vmatpush3.msra.mxu1 %v734_v16 }
 0x284   : > { %1003 = vmatmul.mubr.msk.f32.vlgmr.msra.gmra.mxu1 %vm524_vm7, %v737_v17 }
 0x288   : > { %v743_v19 = vpop.permute.xlu1 %742 }
 0x28b   : > { %v748_v18 = vpop.permute.xlu0 %747 }
 0x28c   : > { %v836_v21 = vpop.permute.xlu1 %835 }
 0x28f   : > { %v838_v20 = vpop.permute.xlu0 %837 }
 0x290   : > { %v840_v24 = vpop.permute.xlu1 %839  ;;  %v843_v30 = vsel %vm698_vm2, %v836_v21, %v838_v20 }
 0x293   : > { %v842_v22 = vpop.permute.xlu0 %841 }
 0x294   : > { %v844_v26 = vsel %vm698_vm2, %v840_v24, %v842_v22 }
 0x344   : > { %v1004_v23 = vpop.f32.mrf.mxu1 }
 0x345   : > { %v828_v25 = vadd.f32 %v1004_v23, %v748_v18 }
 0x346   : > { %v822_v27 = vpop.f32.mrf.mxu1 }
 0x347   : > { %v848_v28 = vadd.f32 %v844_v26, %v828_v25  ;;  %v823_v29 = vadd.f32 %v822_v27, %v743_v19 }
 0x349   : > { %850 = vst [vmem:[%s385_s16 + $0x8] sm:$0xff] %v848_v28  ;;  %v847_v31 = vadd.f32 %v843_v30, %v823_v29 }
 0x34b   : > { %849 = vst [vmem:[%s385_s16] sm:$0xff] %v847_v31 }
 0x34c   : > { %1111 = shalt.err (!%p1108_p11)
}
 0x34d   : > { %s1112_s15 = scalar_lea.hbm %s1448_s26, 256  ;;  %s1116_s30 = scalar_lea.hbm %s1511_s8, 1024 }
 0x34e   : > { %p1113_p12 = scmp.ne.s32.totalorder %s1448_s26, %s1112_s15  ;;  %p1117_p1 = scmp.lt.s32.totalorder %s1448_s26, %s1511_s8 }
 0x34f   : > { %p1118_p2 = scmp.lt.s32.totalorder %s1116_s30, %s1112_s15 }
 0x350   : > { %p1114_p13 = pnand %p1113_p12, %p1310_p8 }
 0x351   : > { %p1119_p3 = por %p1118_p2, %p1117_p1 }
 0x352   : > { %p1115_p0 = pneg %p1114_p13 }
 0x354   : > { %p1120_p4 = pnand %p1119_p3, %p1115_p0 }
 0x356   : > { %1123 = shalt.err (!%p1120_p4)
}
 0x357   : > { %s1202_s21 = smov 128   ;;  %s1203_s22 = smov 256  }
 0x358   : > { %s1204_s18 = smov 8  }
 0x359   : > { %1005 = dma.vmem_to_hbm [thread:$0]  (%p1310_p8), %s1442_s13, 256, %s1448_s26, %s1452_s17, %s1202_s21, %s1203_s22, %s1204_s18  }
 0x35a PF: > { %p1011_p5 = scmp.ge.s32.totalorder %s1190_s12, 2  ;;  %s881_s23 = sand.u32 1, %s1162_s27  }
 0x35b   : > { %s882_s15 = scalar_lea.sflag [#allocation4], %s881_s23 }
 0x35c   : > { %p1008_p6 = pnand %p1011_p5, %p1314_p9 }
 0x35e   : > { %p1009_p7 = pneg %p1008_p6 }
 0x360   : > { %1157 = dma.done.wait (%p1009_p7), %s882_s15, 256  }
 0x361   : > { %1159 = vsyncadd (%p1009_p7), %s882_s15, 4294967040  ;;  %s21_s12 = sadd.s32 1, %s1190_s12   ;;  %s1525_s19 = sld [smem:[#allocation6_spill]] }
 0x362   : > { %p18_p10 = scmp.ge.s32.totalorder %s21_s12, 6   ;;  %s1526_s13 = sld [smem:[#allocation7_spill]] }
 0x363   : > { %s1527_s27 = smov %s1166_s28  ;;  %s1528_s28 = smov %s1170_s29 }
 0x364   : > { %s1529_s29 = smov %s1322_s24  ;;  %s1530_s30 = smov %s1182_s10 }
 0x365   : > { %s1531_s9 = smov %s1186_s11  ;;  %20 = sbr.rel (!%p18_p10) target bundleno = 5 (0x5), region = 133 }
 0x367   : > { %s1532_s10 = smov %s1525_s19 }
 0x368   : > { %s1533_s11 = smov %s1526_s13 }
 0x36a   :  { %887 = vsyncpa [#allocation4], 1 }
 0x36b   :  { %889 = vsyncpa [#allocation4 + $0x1], 1 }

</bundles_post_ra>
